<compile_context>
chip_gen: v6e
topology: v6e:2x2x1
jax: 0.10.0
libtpu: 0.0.40
codegen_flags: <defaults>
</compile_context>

<pallas_src>
import functools
from collections import namedtuple

import numpy as np

import jax
import jax.numpy as jnp
from jax.experimental import pallas as pl
from jax.experimental.pallas import tpu as pltpu


def _round_up(x, m):
    return ((x + m - 1) // m) * m


def _vmem_budget_bytes():
    """Generation-aware scoped-VMEM ceiling (v7x: 64 MiB/TC, v5e/v6e: 128 MiB)."""
    cap = 128 * 1024 * 1024
    try:
        cap = int(pltpu.get_tpu_info().vmem_capacity_bytes)
    except Exception:
        pass
    # Leave headroom for the rest of the program; never ask for more than
    # 100 MiB even on 128 MiB parts.
    return int(min(cap - 12 * 1024 * 1024, 100 * 1024 * 1024))


def _pick_hidden_tile(h_pad, max_tile):
    """Largest tile dividing h_pad, preferring 256-granularity (v6e/v7x MXU)."""
    for align in (256, 128):
        best, t = 0, align
        while t <= min(h_pad, max_tile):
            if h_pad % t == 0:
                best = t
            t += align
        if best:
            return best
    return h_pad


def _footprint_bytes(tb, s_pad, h_pad, th, tk, n_k, in_bytes, cd_bytes):
    """Approximate per-step VMEM footprint of the kernel."""
    x_slab = 2 * tb * s_pad * h_pad * in_bytes           # double-buffered input
    x_cast = tb * s_pad * h_pad * cd_bytes                # in-kernel cast temp
    fh_tile = 2 * h_pad * 2 * th * cd_bytes               # double-buffered hidden DFT
    fs_res = (1 if n_k == 1 else 2) * 2 * s_pad * tk * cd_bytes
    fs_vals = 2 * s_pad * tk * cd_bytes                   # cs/ss loaded values
    z_scr = tb * s_pad * 2 * th * cd_bytes                # stage-1 scratch
    z_f32 = tb * s_pad * 2 * th * 4                       # stage-1 f32 result temp
    out_tile = 2 * tb * s_pad * th * 4                    # double-buffered output
    part_f32 = tb * s_pad * th * 4
    return (x_slab + x_cast + fh_tile + fs_res + fs_vals
            + z_scr + z_f32 + out_tile + part_f32)


_Plan = namedtuple("_Plan", "s_pad h_pad th tk n_k tb n_b n_h cast_input")


def _plan(B, S, H, in_bytes, cd_bytes, max_hidden_tile, budget, seq_block=None):
    h_pad = _round_up(H, 128)
    th = _pick_hidden_tile(h_pad, max(128, int(max_hidden_tile)))
    s_pad = _round_up(S, 8)

    # Seq-DFT streaming: keep only (S_pad, TK) column blocks of [cos_S; sin_S]
    # resident when the full operand would eat too much VMEM (long sequences).
    if seq_block is not None:
        tk = max(128, _round_up(int(seq_block), 128))
        s_pad = _round_up(S, tk)
    elif 2 * s_pad * s_pad * cd_bytes > budget // 3:
        tk = 512
        s_pad = _round_up(S, tk)
    else:
        tk = s_pad
    n_k = s_pad // tk

    cast_input = [False]

    def fits(tb_, th_):
        ib = cd_bytes if cast_input[0] else in_bytes
        return _footprint_bytes(tb_, s_pad, h_pad, th_, tk, n_k,
                                ib, cd_bytes) <= budget

    # Batch tile: largest divisor of B with TB*S_pad <= 256 rows that still
    # fits VMEM -- amortizes DFT-matrix streaming across the batch and fills
    # the MXU M dimension when S is small.
    tb = 1
    for d in range(1, B + 1):
        if B % d == 0 and d * s_pad <= max(256, s_pad) and fits(d, th):
            tb = d

    # Shrink the hidden tile until the footprint fits the VMEM budget.
    while th > 128 and not fits(tb, th):
        th = _pick_hidden_tile(h_pad, th - 128)

    # Last resort: cast the input to the (narrower) compute dtype in the
    # wrapper -- numerically identical to the in-kernel cast that happens
    # anyway, but halves the resident x slab.
    if not fits(tb, th) and cd_bytes < in_bytes:
        cast_input[0] = True
    # TODO(synk): if the footprint still exceeds VMEM (e.g. f32 compute with
    # S >= 2048 and H >= 4096 on v7x) stage 1 also needs an H_pad (K)
    # reduction grid axis; not implemented here.

    n_h = h_pad // th
    n_b = B // tb

    # v7x has two TensorCores: make sure the parallel grid has >= 2 steps.
    if n_b * n_h < 2:
        if B > 1:
            tb = max(d for d in range(1, B // 2 + 1) if B % d == 0)
            n_b = B // tb
        elif h_pad >= 256:
            th = _pick_hidden_tile(h_pad, h_pad // 2)
            n_h = h_pad // th

    return _Plan(s_pad, h_pad, th, tk, n_k, tb, n_b, n_h, cast_input[0])


@functools.lru_cache(maxsize=None)
def _dft_operands(S, H, s_pad, h_pad, th, dtype_name):
    """Host-built (cached) DFT operands.

    Returns:
      fh : (nH, H_pad, 2*TH)  [cos_H | -sin_H] per hidden output tile
      fs : (2, S_pad, S_pad)  [cos_S ; sin_S]
    Zero padding keeps the valid region exact.  Index products use int64 (no
    int32 overflow) and angles are evaluated in float64 for accurate twiddles.
    """
    cdt = jnp.dtype(dtype_name)

    def cos_sin(n, n_pad):
        k = np.arange(n, dtype=np.int64)
        ang = (2.0 * np.pi / n) * np.mod(np.outer(k, k), n).astype(np.float64)
        c = np.zeros((n_pad, n_pad), np.float32)
        s = np.zeros((n_pad, n_pad), np.float32)
        c[:n, :n] = np.cos(ang)
        s[:n, :n] = np.sin(ang)
        return c, s

    ch, sh = cos_sin(H, h_pad)
    n_h = h_pad // th
    fh = np.concatenate([ch.reshape(h_pad, n_h, th),
                         (-sh).reshape(h_pad, n_h, th)], axis=-1)
    fh = np.ascontiguousarray(np.transpose(fh, (1, 0, 2)))   # (nH, H_pad, 2*TH)

    cs, ss = cos_sin(S, s_pad)
    fs = np.stack([cs, ss], axis=0)                           # (2, S_pad, S_pad)
    return jnp.asarray(fh, dtype=cdt), jnp.asarray(fs, dtype=cdt)


def _fourier_kernel(x_ref, fh_ref, fs_ref, o_ref, z_ref, *, n_k):
    # x_ref : (TB, S_pad, H_pad)   input dtype
    # fh_ref: (H_pad, 2*TH)        compute dtype, hidden-DFT tile j
    # fs_ref: (2, S_pad, TK)       compute dtype, seq-DFT column block k
    # o_ref : (TB, S_pad, TH)      float32 (resident across the k axis)
    # z_ref : (TB, S_pad, 2*TH)    compute dtype scratch: [Zr | Zi]
    k = pl.program_id(2)
    cdt = fh_ref.dtype
    tb, s_pad, th = o_ref.shape
    tk = fs_ref.shape[-1]
    h_pad = x_ref.shape[-1]

    # Stage 1 (once per (batch-tile, hidden-tile)):
    #   [Zr | Zi] = x @ [cos_H | -sin_H]        one MXU matmul, f32 accumulate
    def stage1():
        x = x_ref[...].reshape(tb * s_pad, h_pad).astype(cdt)
        z = jnp.dot(x, fh_ref[...], preferred_element_type=jnp.float32)
        z_ref[...] = z.reshape(tb, s_pad, 2 * th).astype(cdt)

    if n_k == 1:
        stage1()
    else:
        pl.when(k == 0)(stage1)

    # Stage 2 (streamed over TK-column blocks of the seq DFT):
    #   Re(Y) += cos_S[:, blk] @ Zr[blk] + sin_S[:, blk] @ Zi[blk]
    cs = fs_ref[0]            # (S_pad, TK)
    ss = fs_ref[1]

    def stage2(accumulate):
        for b in range(tb):                       # static unroll (TB is small)
            if n_k == 1:
                zr = z_ref[b, :, :th]
                zi = z_ref[b, :, th:]
            else:
                row0 = pl.multiple_of(k * tk, tk)
                zr = z_ref[b, pl.ds(row0, tk), :th]
                zi = z_ref[b, pl.ds(row0, tk), th:]
            part = (jnp.dot(cs, zr, preferred_element_type=jnp.float32)
                    + jnp.dot(ss, zi, preferred_element_type=jnp.float32))
            if accumulate:
                o_ref[b] = o_ref[b] + part
            else:
                o_ref[b] = part

    if n_k == 1:
        stage2(False)
    else:
        @pl.when(k == 0)
        def _():
            stage2(False)

        @pl.when(k > 0)
        def _():
            stage2(True)


def fourier_fft_layer(hidden_states, *, compute_dtype=jnp.bfloat16,
                      max_hidden_tile=512, seq_block=None):
    """Pallas implementation of FourierFFTLayer.forward.

    hidden_states: (..., S, H) real array.  Returns float32 of the same shape:
        real(fft(fft(x.float(), axis=-1), axis=-2)).
    compute_dtype: MXU operand dtype (bf16 fast path / f32 exact path).
    seq_block: optional override of the seq-DFT column-block size (multiple of
    128); mainly for exercising the long-sequence streaming path.
    """
    orig_shape = hidden_states.shape
    S, H = orig_shape[-2], orig_shape[-1]
    x = hidden_states.reshape((-1, S, H))
    B = x.shape[0]

    in_bytes = jnp.dtype(x.dtype).itemsize
    cd_bytes = jnp.dtype(compute_dtype).itemsize
    budget = _vmem_budget_bytes()

    p = _plan(B, S, H, in_bytes, cd_bytes, max_hidden_tile, budget, seq_block)
    s_pad, h_pad, th, tk, n_k = p.s_pad, p.h_pad, p.th, p.tk, p.n_k
    tb, n_b, n_h = p.tb, p.n_b, p.n_h

    if p.cast_input:
        x = x.astype(compute_dtype)
        in_bytes = cd_bytes
    if (s_pad, h_pad) != (S, H):
        x = jnp.pad(x, ((0, 0), (0, s_pad - S), (0, h_pad - H)))

    fh, fs = _dft_operands(S, H, s_pad, h_pad, th,
                           jnp.dtype(compute_dtype).name)

    # The seq-DFT operand is grid-constant when it is not streamed: fetch it
    # once and do not waste VMEM on a second buffer.
    if n_k == 1:
        fs_spec = pl.BlockSpec((2, s_pad, tk), lambda bt, j, k: (0, 0, k),
                               pipeline_mode=pl.Buffered(1))
    else:
        fs_spec = pl.BlockSpec((2, s_pad, tk), lambda bt, j, k: (0, 0, k))

    footprint = _footprint_bytes(tb, s_pad, h_pad, th, tk, n_k,
                                 in_bytes, cd_bytes)
    vmem_limit = int(min(budget, max(32 * 1024 * 1024, footprint * 7 // 5)))

    flops = 4 * B * s_pad * h_pad * (h_pad + s_pad)
    bytes_accessed = (B * s_pad * h_pad * (in_bytes + 4)
                      + n_b * 2 * h_pad * h_pad * cd_bytes
                      + (n_b * n_h if n_k > 1 else 1) * 2 * s_pad * s_pad * cd_bytes)

    kernel = functools.partial(_fourier_kernel, n_k=n_k)

    out = pl.pallas_call(
        kernel,
        out_shape=jax.ShapeDtypeStruct((B, s_pad, h_pad), jnp.float32),
        grid_spec=pltpu.PrefetchScalarGridSpec(
            num_scalar_prefetch=0,
            grid=(n_b, n_h, n_k),
            in_specs=[
                pl.BlockSpec((tb, s_pad, h_pad), lambda bt, j, k: (bt, 0, 0)),
                pl.BlockSpec((pl.Squeezed(), h_pad, 2 * th),
                             lambda bt, j, k: (j, 0, 0)),
                fs_spec,
            ],
            out_specs=pl.BlockSpec((tb, s_pad, th), lambda bt, j, k: (bt, 0, j)),
            scratch_shapes=[pltpu.VMEM((tb, s_pad, 2 * th), compute_dtype)],
        ),
        compiler_params=pltpu.CompilerParams(
            dimension_semantics=("parallel", "parallel", "arbitrary"),
            vmem_limit_bytes=vmem_limit),
        cost_estimate=pl.CostEstimate(flops=int(flops), transcendentals=0,
                                      bytes_accessed=int(bytes_accessed)),
    )(x, fh, fs)

    if (s_pad, h_pad) != (S, H):
        out = out[:, :S, :H]
    return out.reshape(orig_shape)


def _fft_ref(x):
    return jnp.real(jnp.fft.fft(
        jnp.fft.fft(x.astype(jnp.float32), axis=-1), axis=-2))


if __name__ == "__main__":
    key = jax.random.PRNGKey(0)
    k0, k1, k2 = jax.random.split(key, 3)

    # --- primary small-shape check (B=2, S=8, H=32) -------------------------
    B, S, H = 2, 8, 32
    hidden_states = jax.random.normal(k0, (B, S, H), dtype=jnp.float32)
    ref = _fft_ref(hidden_states)

    # Exact path: f32 MXU operands.
    out_f32 = jax.block_until_ready(
        fourier_fft_layer(hidden_states, compute_dtype=jnp.float32))
    assert out_f32.shape == (B, S, H) and out_f32.dtype == jnp.float32
    assert jnp.allclose(out_f32, ref, atol=2e-3, rtol=2e-3), \
        float(jnp.max(jnp.abs(out_f32 - ref)))

    # Default fast path: bf16 MXU operands with f32 accumulation.
    out_bf16 = jax.block_until_ready(fourier_fft_layer(hidden_states))
    assert out_bf16.shape == (B, S, H) and out_bf16.dtype == jnp.float32
    tol = 3e-2 * float(jnp.max(jnp.abs(ref)))
    assert jnp.allclose(out_bf16, ref, atol=tol, rtol=3e-2), \
        float(jnp.max(jnp.abs(out_bf16 - ref)))

    # --- batch-tiled path (TB > 1) ------------------------------------------
    x2 = jax.random.normal(k1, (4, 8, 256), dtype=jnp.float32)
    ref2 = _fft_ref(x2)
    out2 = jax.block_until_ready(
        fourier_fft_layer(x2, compute_dtype=jnp.float32))
    tol2 = 2e-3 * float(jnp.max(jnp.abs(ref2)))
    assert jnp.allclose(out2, ref2, atol=tol2, rtol=2e-3), \
        float(jnp.max(jnp.abs(out2 - ref2)))

    # --- streamed seq-DFT path (n_k > 1, output accumulation) ---------------
    x3 = jax.random.normal(k2, (2, 256, 128), dtype=jnp.float32)
    ref3 = _fft_ref(x3)
    out3 = jax.block_until_ready(
        fourier_fft_layer(x3, compute_dtype=jnp.float32, seq_block=128))
    tol3 = 2e-3 * float(jnp.max(jnp.abs(ref3)))
    assert jnp.allclose(out3, ref3, atol=tol3, rtol=2e-3), \
        float(jnp.max(jnp.abs(out3 - ref3)))

    print("KERNEL_OK")
</pallas_src>

<mosaic_0001>
module attributes {stable_mosaic.version = 11 : i64} {
  func.func @_fourier_kernel(%arg0: i32, %arg1: i32, %arg2: i32, %arg3: memref<1x8x128xf32, #tpu.memory_space<vmem>>, %arg4: memref<1x128x256xf32, #tpu.memory_space<vmem>>, %arg5: memref<2x8x8xf32, #tpu.memory_space<vmem>>, %arg6: memref<1x8x128xf32, #tpu.memory_space<vmem>>, %arg7: memref<1x8x256xf32, #tpu.memory_space<vmem>>) attributes {dimension_semantics = [#tpu.dimension_semantics<parallel>, #tpu.dimension_semantics<parallel>, #tpu.dimension_semantics<arbitrary>], iteration_bounds = array<i64: 2, 1, 1>, scalar_prefetch = 0 : i64, scratch_operands = 1 : i64, tpu.core_type = #tpu.core_type<tc>, window_params = [{transform_indices = @transform_0, window_bounds = array<i64: 1, 8, 128>}, {transform_indices = @transform_1, window_bounds = array<i64: 1, 128, 256>}, {pipeline_mode = #tpu.pipeline_mode<synchronous>, transform_indices = @transform_2, window_bounds = array<i64: 2, 8, 8>}, {transform_indices = @transform_3, window_bounds = array<i64: 1, 8, 128>}]} {
    %c0 = arith.constant 0 : index
    %c0_0 = arith.constant 0 : index
    %c0_1 = arith.constant 0 : index
    %0 = vector.load %arg3[%c0, %c0_0, %c0_1] : memref<1x8x128xf32, #tpu.memory_space<vmem>>, vector<1x8x128xf32>
    %1 = vector.shape_cast %0 : vector<1x8x128xf32> to vector<8x128xf32>
    %c0_2 = arith.constant 0 : index
    %c0_3 = arith.constant 0 : index
    %c0_4 = arith.constant 0 : index
    %2 = vector.load %arg4[%c0_2, %c0_3, %c0_4] : memref<1x128x256xf32, #tpu.memory_space<vmem>>, vector<1x128x256xf32>
    %3 = vector.shape_cast %2 : vector<1x128x256xf32> to vector<128x256xf32>
    %cst = arith.constant dense<0.000000e+00> : vector<8x256xf32>
    %4 = tpu.matmul %1, %3, %cst {dimension_numbers = #tpu.dot_dimension_numbers<[1], [0], [0], [1], [0, 0, 1, 1], [], []>} : vector<8x128xf32>, vector<128x256xf32>, vector<8x256xf32> -> vector<8x256xf32>
    %5 = vector.shape_cast %4 : vector<8x256xf32> to vector<1x8x256xf32>
    %c0_5 = arith.constant 0 : index
    %c0_6 = arith.constant 0 : index
    %c0_7 = arith.constant 0 : index
    %6 = vector.load %arg7[%c0_5, %c0_6, %c0_7] : memref<1x8x256xf32, #tpu.memory_space<vmem>>, vector<1x8x256xf32>
    tpu.vector_store %arg7[%c0_5, %c0_6, %c0_7], %5 {strides = array<i32>} : memref<1x8x256xf32, #tpu.memory_space<vmem>>, vector<1x8x256xf32>,
    %c0_8 = arith.constant 0 : index
    %c0_9 = arith.constant 0 : index
    %c0_10 = arith.constant 0 : index
    %7 = vector.load %arg5[%c0_8, %c0_9, %c0_10] : memref<2x8x8xf32, #tpu.memory_space<vmem>>, vector<1x8x8xf32>
    %8 = vector.shape_cast %7 : vector<1x8x8xf32> to vector<8x8xf32>
    %c1 = arith.constant 1 : index
    %c0_11 = arith.constant 0 : index
    %c0_12 = arith.constant 0 : index
    %9 = vector.load %arg5[%c1, %c0_11, %c0_12] : memref<2x8x8xf32, #tpu.memory_space<vmem>>, vector<1x8x8xf32>
    %10 = vector.shape_cast %9 : vector<1x8x8xf32> to vector<8x8xf32>
    %c0_13 = arith.constant 0 : index
    %c0_14 = arith.constant 0 : index
    %c0_15 = arith.constant 0 : index
    %11 = vector.load %arg7[%c0_13, %c0_14, %c0_15] : memref<1x8x256xf32, #tpu.memory_space<vmem>>, vector<1x8x128xf32>
    %12 = vector.shape_cast %11 : vector<1x8x128xf32> to vector<8x128xf32>
    %c0_16 = arith.constant 0 : index
    %c0_17 = arith.constant 0 : index
    %c128 = arith.constant 128 : index
    %13 = vector.load %arg7[%c0_16, %c0_17, %c128] : memref<1x8x256xf32, #tpu.memory_space<vmem>>, vector<1x8x128xf32>
    %14 = vector.shape_cast %13 : vector<1x8x128xf32> to vector<8x128xf32>
    %cst_18 = arith.constant dense<0.000000e+00> : vector<8x128xf32>
    %15 = tpu.matmul %8, %12, %cst_18 {dimension_numbers = #tpu.dot_dimension_numbers<[1], [0], [0], [1], [0, 0, 1, 1], [], []>} : vector<8x8xf32>, vector<8x128xf32>, vector<8x128xf32> -> vector<8x128xf32>
    %cst_19 = arith.constant dense<0.000000e+00> : vector<8x128xf32>
    %16 = tpu.matmul %10, %14, %cst_19 {dimension_numbers = #tpu.dot_dimension_numbers<[1], [0], [0], [1], [0, 0, 1, 1], [], []>} : vector<8x8xf32>, vector<8x128xf32>, vector<8x128xf32> -> vector<8x128xf32>
    %17 = arith.addf %15, %16 : vector<8x128xf32>
    %c0_20 = arith.constant 0 : index
    %c0_21 = arith.constant 0 : index
    %c0_22 = arith.constant 0 : index
    %18 = vector.load %arg6[%c0_20, %c0_21, %c0_22] : memref<1x8x128xf32, #tpu.memory_space<vmem>>, vector<1x8x128xf32>
    %19 = vector.shape_cast %18 : vector<1x8x128xf32> to vector<8x128xf32>
    %20 = vector.shape_cast %17 : vector<8x128xf32> to vector<1x8x128xf32>
    tpu.vector_store %arg6[%c0_20, %c0_21, %c0_22], %20 {strides = array<i32>} : memref<1x8x128xf32, #tpu.memory_space<vmem>>, vector<1x8x128xf32>,
    return
  }
  func.func @transform_0(%arg0: i32, %arg1: i32, %arg2: i32) -> (i32, i32, i32) {
    %c0_i32 = arith.constant 0 : i32
    %c0_i32_0 = arith.constant 0 : i32
    %c0_i32_1 = arith.constant 0 : i32
    return %arg0, %c0_i32, %c0_i32_0 : i32, i32, i32
  }
  func.func @transform_1(%arg0: i32, %arg1: i32, %arg2: i32) -> (i32, i32, i32) {
    %c0_i32 = arith.constant 0 : i32
    %c0_i32_0 = arith.constant 0 : i32
    %c0_i32_1 = arith.constant 0 : i32
    return %arg1, %c0_i32, %c0_i32_0 : i32, i32, i32
  }
  func.func @transform_2(%arg0: i32, %arg1: i32, %arg2: i32) -> (i32, i32, i32) {
    %c0_i32 = arith.constant 0 : i32
    %c0_i32_0 = arith.constant 0 : i32
    %c0_i32_1 = arith.constant 0 : i32
    return %c0_i32, %c0_i32_0, %arg2 : i32, i32, i32
  }
  func.func @transform_3(%arg0: i32, %arg1: i32, %arg2: i32) -> (i32, i32, i32) {
    %c0_i32 = arith.constant 0 : i32
    %c0_i32_0 = arith.constant 0 : i32
    return %arg0, %c0_i32, %arg1 : i32, i32, i32
  }
}

</mosaic_0001>

<bundles_post_ra>
// kernel: tpu_custom_call.1
= control target key start
LH: loop header
LB: loop body
LE: loop exit
PB: predicated region body
PF: predicated region fallthrough
CT: control target
= control target key end

     0   :  { %8 = vsyncpa [#allocation4], 0  ;;  %s1140_s0 = inlined_call_operand.hbm [shape: f32[2,8,128], index: 0, kind: input, shape index: {}]   ;;  %s1141_s1 = inlined_call_operand.hbm [shape: f32[1,128,256], index: 1, kind: input, shape index: {}]   ;;  %s1142_s2 = inlined_call_operand.hbm [shape: f32[2,8,8], index: 2, kind: input, shape index: {}]   ;;  %s1143_s3 = inlined_call_operand.hbm [shape: f32[2,8,128], index: 3, kind: output, shape index: {}]  }
   0x1   :  { %10 = vsyncpa [#allocation4 + $0x1], 0 }
   0x2   :  { %11 = vsyncpa [#allocation7], 0 }
   0x3   :  { %12 = vsyncpa [#allocation5], 0 }
   0x4   :  { %14 = vsyncpa [#allocation5 + $0x1], 0  ;;  %s948_s12 = smov 0   ;;  %s950_s13 = smov 0  }
   0x5   :  { %s952_s14 = smov 0   ;;  %s954_s15 = smov 0  }
   0x6   :  { %s956_s16 = smov 0   ;;  %s958_s17 = smov 0  }
   0x7 LB: > { %s630_s18 = sadd.s32 4294967295, %s916_s17   ;;  %s631_s19 = sadd.s32 4294967294, %s916_s17   ;;  %s916_s17 = sphi %s958_s17, %s20_s17   ;;  %s912_s16 = sphi %s956_s16, %s1163_s16   ;;  %s908_s15 = sphi %s954_s15, %s1162_s15   ;;  %s904_s14 = sphi %s952_s14, %s1161_s14   ;;  %s900_s13 = sphi %s950_s13, %s1160_s13   ;;  %s896_s12 = sphi %s948_s12, %s1159_s12  }
   0x8   : > { %p59_p0 = scmp.ne.s32.totalorder %s900_s13, %s896_s12  ;;  %p982_p1 = scmp.eq.s32.totalorder %s630_s18, 0 }
   0x9   : > { %p986_p2 = scmp.eq.s32.totalorder %s630_s18, 1  ;;  %p143_p3 = scmp.eq.s32.totalorder %s631_s19, 1 }
   0xa   : > { %s1147_s20 = scalar_select %p982_p1, 1, 0 }
   0xb   : > { %p992_p4 = por %p982_p1, %p59_p0  ;;  %p632_p5 = scmp.ge.s32.totalorder %s916_s17, 1 }
   0xc   : > { %p997_p6 = por %p143_p3, %p59_p0  ;;  %p150_p7 = scmp.lt.s32.totalorder %s916_s17, 3 }
   0xd   : > { %s1149_s22 = scalar_select %p992_p4, 1, 0 }
   0xe   : > { %s1150_s23 = scalar_select %p997_p6, 1, 0 }
   0xf   : > { %p1002_p8 = pnand %p632_p5, %p150_p7  ;;  %s918_s25 = smov [#allocation6]  }
  0x10   : > { %s165_s26 = sshll.u32 %s918_s25, 4  ;;  %s919_s28 = smov [#allocation8]   ;;  %s166_s26 = int_to_ptr.vmem [resolvable:$true] %s165_s26 }
  0x11   : > { %p675_p9 = pneg %p1002_p8  ;;  %s180_s29 = sshll.u32 %s919_s28, 4  ;;  %s181_s29 = int_to_ptr.vmem [resolvable:$true] %s180_s29 }
  0x12   : > { %s763_s30 = scalar_lea.vmem %s166_s26, 4096  ;;  %p771_p5 = scmp.lt.s32.totalorder %s166_s26, %s166_s26 }
  0x13   : > { %p1011_p11 = pnand %p675_p9, %p982_p1  ;;  %p764_p13 = scmp.ne.s32.totalorder %s166_s26, %s763_s30 }
  0x14   : > { %p772_p7 = scmp.lt.s32.totalorder %s763_s30, %s763_s30 }
  0x15   : > { %p754_p12 = pneg %p1011_p11 }
  0x16   : > { %p773_p10 = por %p772_p7, %p771_p5 }
  0x17   : > { %p766_p0 = pnand %p764_p13, %p754_p12 }
  0x19   : > { %p767_p3 = pneg %p766_p0 }
  0x1b   : > { %p774_p9 = pnand %p773_p10, %p767_p3 }
  0x1d   : > { %777 = shalt.err (!%p774_p9)
}
  0x1e   : > { %s920_s4 = smov 256   ;;  %s921_s5 = smov 16  }
  0x1f   : > { %678 = dma.hbm_to_vmem [thread:$0]  (!%p1011_p11), %s1141_s1, 4096, %s166_s26, [#allocation7], %s920_s4, %s920_s4, %s921_s5  }
  0x20   : > { %s789_s8 = scalar_lea.vmem %s181_s29, 256  ;;  %p797_p1 = scmp.lt.s32.totalorder %s181_s29, %s181_s29 }
  0x21   : > { %p790_p6 = scmp.ne.s32.totalorder %s181_s29, %s789_s8  ;;  %p798_p4 = scmp.lt.s32.totalorder %s789_s8, %s789_s8 }
  0x23   : > { %p792_p13 = pnand %p790_p6, %p754_p12  ;;  %p799_p5 = por %p798_p4, %p797_p1 }
  0x25   : > { %p793_p0 = pneg %p792_p13 }
  0x27   : > { %p800_p10 = pnand %p799_p5, %p793_p0 }
  0x29   : > { %803 = shalt.err (!%p800_p10)
}
  0x2a   : > { %s922_s9 = smov 128   ;;  %s923_s10 = smov 8  }
  0x2b   : > { %681 = dma.hbm_to_vmem [thread:$0]  (!%p1011_p11), %s1142_s2, 256, %s181_s29, [#allocation7], %s922_s9, %s922_s9, %s923_s10  }
  0x2c   : > { %s39_s19 = sadd.s32 1, %s912_s16  ;;  %s46_s25 = sadd.s32 1, %s904_s14 }
  0x2d   : > { %p41_p1 = scmp.ge.s32.totalorder %s39_s19, 2  ;;  %p53_p4 = scmp.ne.s32.totalorder %s904_s14, %s900_s13 }
  0x2e   : > { %p54_p6 = scmp.eq.s32.totalorder %s916_s17, 0  ;;  %p692_p12 = scmp.lt.s32.totalorder %s916_s17, 2 }
  0x2f   : > { %s1165_s19 = smov (%p41_p1, %s39_s19), 0  ;;  %p1043_p7 = por %p986_p2, %p53_p4 }
  0x30   : > { %p55_p3 = por %p54_p6, %p53_p4  ;;  %s43_s27 = ssub.s32 %s912_s16, %s1165_s19 }
  0x31   : > { %s194_s28 = sand.u32 1, %s904_s14   ;;  %p44_p9 = scmp.eq.s32.totalorder %s43_s27, 0 }
  0x32   : > { %s636_s29 = sshll.u32 %s194_s28, 3  ;;  %s637_s30 = sshll.u32 %s912_s16, 7 }
  0x33   : > { %s1052_s4 = scalar_select %p44_p9, %s904_s14, %s46_s25  }
  0x34   : > { %s203_s7 = scalar_lea.hbm %s1140_s0, %s637_s30  ;;  %s198_s8 = scalar_lea.vmem [#allocation3], %s636_s29 }
  0x35   : > { %s205_s9 = sshll.u32 %s198_s8, 4  ;;  %p1059_p11 = pnand %p692_p12, %p55_p3  ;;  %s206_s9 = int_to_ptr.vmem [resolvable:$true] %s205_s9 }
  0x36   : > { %s195_s10 = scalar_lea.sflag [#allocation4], %s194_s28  ;;  %s817_s11 = scalar_lea.vmem %s206_s9, 128 }
  0x37   : > { %p806_p2 = pneg %p1059_p11  ;;  %p818_p13 = scmp.ne.s32.totalorder %s206_s9, %s817_s11 }
  0x38   : > { %s924_s18 = smov [#allocation3]  }
  0x39   : > { %p820_p0 = pnand %p818_p13, %p806_p2  ;;  %s822_s25 = sshll.u32 %s924_s18, 4  ;;  %s823_s25 = int_to_ptr.vmem [resolvable:$false] %s822_s25 }
  0x3a   : > { %s824_s27 = scalar_lea.vmem %s823_s25, 256  ;;  %p825_p10 = scmp.lt.s32.totalorder %s206_s9, %s823_s25 }
  0x3b   : > { %p821_p5 = pneg %p820_p0  ;;  %p826_p1 = scmp.lt.s32.totalorder %s824_s27, %s817_s11 }
  0x3d   : > { %p827_p4 = por %p826_p1, %p825_p10 }
  0x3f   : > { %p828_p6 = pnand %p827_p4, %p821_p5 }
  0x41   : > { %831 = shalt.err (!%p828_p6)
}
  0x42   : > { %685 = dma.hbm_to_vmem [thread:$0]  (!%p1059_p11), %s203_s7, 128, %s206_s9, %s195_s10  }
  0x43   : > { %214 = sbr.rel (%p1002_p8) target bundleno = 518 (0x206), region = 32  ;;  %s1070_s28 = sand.u32 (!%p1002_p8), 1, %s900_s13  }
  0x44   : > { %s639_s29 = sshll.u32 (!%p1002_p8), %s1070_s28, 3  ;;  %s217_s30 = scalar_lea.sflag (!%p1002_p8), [#allocation4], %s1070_s28 }
  0x45   : > { %s1076_s5 = scalar_lea.vmem (!%p1002_p8), [#allocation3], %s639_s29  ;;  %p1155_p12 = scmp.ne.s32.totalorder (!%p1002_p8), %s1149_s22, 0 }
  0x48   : > { %883 = dma.done.wait (%p1155_p12), %s217_s30, 128  }
  0x49   : > { %885 = vsyncadd (%p1155_p12), %s217_s30, 4294967168  ;;  %p1156_p3 = scmp.ne.s32.totalorder %s1147_s20, 0 }
  0x4b   : > { %887 = dma.done.wait (%p1156_p3), [#allocation7], 4352  }
  0x4c   : > { %889 = vsyncadd (%p1156_p3), [#allocation7], 4294962944  ;;  %v925_v0 = vmov 0.0   ;;  %v283_v1 = vld [vmem:[#allocation6 + $0xf8] sm:$0xff]  ;;  %v282_v2 = vld [vmem:[#allocation6 + $0xf0] sm:$0xff]  ;;  %vm926_vm0 = vmmov 0  }
  0x4d   : > { %348 = vmatprep.mubr.f32.mxu0 %v925_v0  ;;  %653 = vmatprep.subr.mxu1 %v925_v0  ;;  %v281_v3 = vld [vmem:[#allocation6 + $0xe8] sm:$0xff]  ;;  %v280_v4 = vld [vmem:[#allocation6 + $0xe0] sm:$0xff]  ;;  %v279_v5 = vld [vmem:[#allocation6 + $0xd8] sm:$0xff]  ;;  %vm362_vm1 = vcmask 64512   ;;  %s646_s20 = sshll.u32 %s908_s15, 7  ;;  %s250_s22 = scalar_lea.vmem [#allocation9], %s639_s29 }
  0x4e   : > { %284 = vmatprep.subr.mxu0 %v283_v1  ;;  %v278_v6 = vld [vmem:[#allocation6 + $0xd0] sm:$0xff]  ;;  %v277_v7 = vld [vmem:[#allocation6 + $0xc8] sm:$0xff]  ;;  %v276_v8 = vld [vmem:[#allocation6 + $0xc0] sm:$0xff]  ;;  %655 = vmatprep.mubr.msk.f32.mxu1 %vm926_vm0, %v925_v0  ;;  %s525_s24 = sshll.u32 %s250_s22, 4  ;;  %s1098_s8 = scalar_lea.hbm %s1143_s3, %s646_s20  ;;  %s526_s24 = int_to_ptr.vmem [resolvable:$true] %s525_s24 }
  0x4f   : > { %285 = vmatpush1.msra.mxu0 %v282_v2  ;;  %v275_v9 = vld [vmem:[#allocation6 + $0xb8] sm:$0xff]  ;;  %v274_v10 = vld [vmem:[#allocation6 + $0xb0] sm:$0xff]  ;;  %v273_v11 = vld [vmem:[#allocation6 + $0xa8] sm:$0xff]  ;;  %s511_s9 = scalar_lea.sflag [#allocation5], %s1070_s28  ;;  %s832_s21 = scalar_lea.vmem %s526_s24, 128 }
  0x50   : > { %286 = vmatprep.subr.mxu0 %v281_v3  ;;  %v272_v12 = vld [vmem:[#allocation6 + $0xa0] sm:$0xff]  ;;  %v271_v13 = vld [vmem:[#allocation6 + $0x98] sm:$0xff]  ;;  %v270_v14 = vld [vmem:[#allocation6 + $0x90] sm:$0xff]  ;;  %p833_p8 = scmp.ne.s32.totalorder %s526_s24, %s832_s21  ;;  %s927_s15 = smov [#allocation9]  }
  0x51   : > { %287 = vmatpush1.msra.mxu0 %v280_v4  ;;  %v269_v15 = vld [vmem:[#allocation6 + $0x88] sm:$0xff]  ;;  %v268_v16 = vld [vmem:[#allocation6 + $0x80] sm:$0xff]  ;;  %v267_v17 = vld [vmem:[#allocation6 + $0x78] sm:$0xff]  ;;  %s836_s10 = sshll.u32 %s927_s15, 4  ;;  %s837_s10 = int_to_ptr.vmem [resolvable:$false] %s836_s10 }
  0x52   : > { %288 = vmatprep.subr.mxu0 %v279_v5  ;;  %v266_v18 = vld [vmem:[#allocation6 + $0x70] sm:$0xff]  ;;  %v265_v19 = vld [vmem:[#allocation6 + $0x68] sm:$0xff]  ;;  %v264_v20 = vld [vmem:[#allocation6 + $0x60] sm:$0xff]  ;;  %p834_p9 = pnand %p833_p8, %p1043_p7  ;;  %s838_s11 = scalar_lea.vmem %s837_s10, 256 }
  0x53   : > { %289 = vmatpush1.msra.mxu0 %v278_v6  ;;  %v263_v21 = vld [vmem:[#allocation6 + $0x58] sm:$0xff]  ;;  %v262_v22 = vld [vmem:[#allocation6 + $0x50] sm:$0xff]  ;;  %v261_v23 = vld [vmem:[#allocation6 + $0x48] sm:$0xff]  ;;  %p839_p2 = scmp.lt.s32.totalorder %s526_s24, %s837_s10  ;;  %p840_p13 = scmp.lt.s32.totalorder %s838_s11, %s832_s21 }
  0x54   : > { %290 = vmatprep.subr.mxu0 %v277_v7  ;;  %v260_v24 = vld [vmem:[#allocation6 + $0x40] sm:$0xff]  ;;  %v259_v25 = vld [vmem:[#allocation6 + $0x38] sm:$0xff]  ;;  %v258_v26 = vld [vmem:[#allocation6 + $0x30] sm:$0xff]  ;;  %p835_p11 = pneg %p834_p9 }
  0x55   : > { %291 = vmatpush1.msra.mxu0 %v276_v8  ;;  %v257_v27 = vld [vmem:[#allocation6 + $0x28] sm:$0xff]  ;;  %v256_v28 = vld [vmem:[#allocation6 + $0x20] sm:$0xff]  ;;  %v255_v29 = vld [vmem:[#allocation6 + $0x18] sm:$0xff]  ;;  %p841_p0 = por %p840_p13, %p839_p2 }
  0x56   : > { %292 = vmatprep.subr.mxu0 %v275_v9  ;;  %v254_v30 = vld [vmem:[#allocation6 + $0x10] sm:$0xff]  ;;  %v253_v31 = vld [vmem:[#allocation6 + $0x8] sm:$0xff]  ;;  %v252_v32 = vld [vmem:[#allocation6] sm:$0xff] }
  0x57   : > { %293 = vmatpush1.msra.mxu0 %v274_v10  ;;  %v251_v33 = vld [vmem:[%s1076_s5] sm:$0xff]  ;;  %v359_v35 = vld [vmem:[#allocation8 + $0x8] sm:$0xff]  ;;  %v357_v37 = vld [vmem:[#allocation8] sm:$0xff]  ;;  %p842_p5 = pnand %p841_p0, %p835_p11 }
  0x58   : > { %294 = vmatprep.subr.mxu0 %v273_v11 }
  0x59   : > { %295 = vmatpush1.msra.mxu0 %v272_v12 }
  0x5a   : > { %296 = vmatprep.subr.mxu0 %v271_v13 }
  0x5b   : > { %297 = vmatpush1.msra.mxu0 %v270_v14 }
  0x5c   : > { %298 = vmatprep.subr.mxu0 %v269_v15 }
  0x5d   : > { %299 = vmatpush1.msra.mxu0 %v268_v16 }
  0x5e   : > { %300 = vmatprep.subr.mxu0 %v267_v17 }
  0x5f   : > { %301 = vmatpush1.msra.mxu0 %v266_v18 }
  0x60   : > { %302 = vmatprep.subr.mxu0 %v265_v19 }
  0x61   : > { %303 = vmatpush1.msra.mxu0 %v264_v20 }
  0x62   : > { %304 = vmatprep.subr.mxu0 %v263_v21 }
  0x63   : > { %305 = vmatpush1.msra.mxu0 %v262_v22 }
  0x64   : > { %306 = vmatprep.subr.mxu0 %v261_v23 }
  0x65   : > { %307 = vmatpush1.msra.mxu0 %v260_v24 }
  0x66   : > { %308 = vmatprep.subr.mxu0 %v259_v25 }
  0x67   : > { %309 = vmatpush1.msra.mxu0 %v258_v26 }
  0x68   : > { %310 = vmatprep.subr.mxu0 %v257_v27 }
  0x69   : > { %311 = vmatpush1.msra.mxu0 %v256_v28 }
  0x6a   : > { %312 = vmatprep.subr.mxu0 %v255_v29 }
  0x6b   : > { %313 = vmatpush1.msra.mxu0 %v254_v30 }
  0x6c   : > { %314 = vmatprep.subr.mxu0 %v253_v31 }
  0x6d   : > { %315 = vmatpush1.msra.mxu0 %v252_v32 }
  0x6e   : > { %349 = vmatmul.mubr.f32.vlgmr.msra.gmra.mxu0 %v251_v33 }
 0x12e   : > { %v350_v34 = vpop.f32.mrf.mxu0 }
 0x130   : > { %v352_v36 = vpop.f32.mrf.mxu0 }
 0x131   : > { %654 = vmatpush3.msra.mxu1 %v352_v36 }
 0x132   : > { %656 = vmatmul.mubr.msk.f32.vlgmr.msra.gmra.mxu1 %vm362_vm1, %v359_v35  ;;  %658 = vmatprep.subr.mxu1 %v925_v0 }
 0x133   : > { %659 = vmatpush3.msra.mxu1 %v350_v34  ;;  %660 = vmatprep.mubr.msk.f32.mxu1 %vm926_vm0, %v925_v0 }
 0x136   : > { %661 = vmatmul.mubr.msk.f32.vlgmr.msra.gmra.mxu1 %vm362_vm1, %v357_v37 }
 0x1f2   : > { %v432_v38 = vpop.f32.mrf.mxu1 }
 0x1f4   : > { %v657_v39 = vpop.f32.mrf.mxu1 }
 0x1f6   : > { %v505_v40 = vpop.f32.mrf.mxu1 }
 0x1f7   : > { %v506_v41 = vadd.f32 %v505_v40, %v432_v38 }
 0x1f8   : > { %v662_v42 = vpop.f32.mrf.mxu1 }
 0x1f9   : > { %509 = vst [vmem:[%s250_s22] sm:$0xff] %v506_v41 }
 0x1fa   : > { %845 = shalt.err (!%p842_p5)
}
 0x1fb   : > { %s846_s18 = scalar_lea.hbm %s1098_s8, 128  ;;  %s850_s28 = scalar_lea.hbm %s1143_s3, 256 }
 0x1fc   : > { %p847_p10 = scmp.ne.s32.totalorder %s1098_s8, %s846_s18  ;;  %p851_p6 = scmp.lt.s32.totalorder %s1098_s8, %s1143_s3 }
 0x1fd   : > { %p852_p12 = scmp.lt.s32.totalorder %s850_s28, %s846_s18 }
 0x1fe   : > { %p848_p1 = pnand %p847_p10, %p1043_p7 }
 0x1ff   : > { %p853_p3 = por %p852_p12, %p851_p6 }
 0x200   : > { %p849_p4 = pneg %p848_p1 }
 0x202   : > { %p854_p8 = pnand %p853_p3, %p849_p4 }
 0x204   : > { %857 = shalt.err (!%p854_p8)
}
 0x205   : > { %673 = dma.vmem_to_hbm [thread:$0]  (%p1043_p7), %s526_s24, 128, %s1098_s8, %s511_s9  }
 0x206 PF: > { %s537_s5 = sand.u32 1, %s896_s12   ;;  %p1157_p9 = scmp.ne.s32.totalorder %s1150_s23, 0 }
 0x207   : > { %p1158_p11 = scmp.ge.s32.totalorder %s916_s17, 2  ;;  %s538_s20 = scalar_lea.sflag [#allocation5], %s537_s5 }
 0x209   : > { %p687_p2 = pnand %p1158_p11, %p1157_p9 }
 0x20b   : > { %p688_p13 = pneg %p687_p2 }
 0x20d   : > { %891 = dma.done.wait (%p688_p13), %s538_s20, 128  }
 0x20e   : > { %893 = vsyncadd (%p688_p13), %s538_s20, 4294967168  ;;  %s20_s17 = sadd.s32 1, %s916_s17   ;;  %s1159_s12 = smov %s900_s13 }
 0x20f   : > { %p17_p0 = scmp.ge.s32.totalorder %s20_s17, 4   ;;  %s1160_s13 = smov %s904_s14 }
 0x210   : > { %s1161_s14 = smov %s1052_s4  ;;  %s1162_s15 = smov %s912_s16 }
 0x211   : > { %s1163_s16 = smov %s1165_s19  ;;  %19 = sbr.rel (!%p17_p0) target bundleno = 7 (0x7), region = 88 }
 0x216   :  { %543 = vsyncpa [#allocation4], 1 }
 0x217   :  { %545 = vsyncpa [#allocation4 + $0x1], 1 }
 0x218   :  { %546 = vsyncpa [#allocation7], 1 }
 0x219   :  { %547 = vsyncpa [#allocation5], 1 }
 0x21a   :  { %549 = vsyncpa [#allocation5 + $0x1], 1 }

</bundles_post_ra>
